<compile_context>
chip_gen: v7x
topology: tpu7x:2x2x1
jax: 0.10.0
libtpu: 0.0.40
codegen_flags: <defaults>
</compile_context>

<pallas_src>
import functools

import jax
import jax.numpy as jnp
from jax import lax
from jax.experimental import pallas as pl
from jax.experimental.pallas import tpu as pltpu

NEG_SLOPE = 0.2
BN_EPS = 1e-5                      # nn.BatchNorm2d default
VMEM_LIMIT = 48 << 20              # safe on v5e/v6e (128 MiB) and v7x (64 MiB)


def _round_up(x, m):
    return -(-x // m) * m


def _pad_rows(a, mult):
    m = a.shape[0]
    mp = _round_up(m, mult)
    if mp != m:
        a = jnp.pad(a, ((0, mp - m),) + ((0, 0),) * (a.ndim - 1))
    return a, m


# ----------------------------------------------------------------------------
# Pallas kernels
# ----------------------------------------------------------------------------
def _conv_act_matmul_kernel(p_ref, w_ref, o_ref):
    """Tiled matmul accumulating into the resident output + fused LeakyReLU."""
    k = pl.program_id(2)

    @pl.when(k == 0)
    def _init():
        o_ref[...] = jnp.zeros_like(o_ref)

    o_ref[...] += jnp.dot(p_ref[...], w_ref[...],
                          preferred_element_type=jnp.float32)

    @pl.when(k == pl.num_programs(2) - 1)
    def _act():
        y = o_ref[...]
        o_ref[...] = jnp.where(y >= 0, y, NEG_SLOPE * y)


def _conv_bn_matmul_kernel(p_ref, w_ref, o_ref, stats_ref):
    """Tiled matmul + per-(M-tile) column sum / sum-of-squares for BatchNorm."""
    k = pl.program_id(2)

    @pl.when(k == 0)
    def _init():
        o_ref[...] = jnp.zeros_like(o_ref)

    o_ref[...] += jnp.dot(p_ref[...], w_ref[...],
                          preferred_element_type=jnp.float32)

    @pl.when(k == pl.num_programs(2) - 1)
    def _stats():
        z = o_ref[...]
        col_sum = jnp.sum(z, axis=0, keepdims=True)       # (1, tn)
        col_sq = jnp.sum(z * z, axis=0, keepdims=True)    # (1, tn)
        stats_ref[...] = jnp.concatenate([col_sum, col_sq], axis=0)[None, :, :]


def _bn_act_kernel(m_ref, z_ref, stats_ref, g_ref, b_ref, o_ref):
    """Training-mode BatchNorm (batch stats over valid rows) + LeakyReLU."""
    inv_m = 1.0 / m_ref[0].astype(jnp.float32)
    s = stats_ref[...]                                    # (nm_tiles, 2, tn)
    mean = jnp.sum(s[:, 0, :], axis=0, keepdims=True) * inv_m
    ex2 = jnp.sum(s[:, 1, :], axis=0, keepdims=True) * inv_m
    var = jnp.maximum(ex2 - mean * mean, 0.0)             # biased variance
    y = (z_ref[...] - mean) * lax.rsqrt(var + BN_EPS) * g_ref[...] + b_ref[...]
    o_ref[...] = jnp.where(y >= 0, y, NEG_SLOPE * y)


def _linear_kernel(x_ref, w_ref, b_ref, o_ref):
    k = pl.program_id(0)

    @pl.when(k == 0)
    def _init():
        o_ref[...] = jnp.zeros_like(o_ref)

    o_ref[...] += jnp.dot(x_ref[...], w_ref[...],
                          preferred_element_type=jnp.float32)

    @pl.when(k == pl.num_programs(0) - 1)
    def _bias():
        o_ref[...] += b_ref[...]


# ----------------------------------------------------------------------------
# Kernel wrappers
# ----------------------------------------------------------------------------
def _tiles(m, n, k):
    tm = min(256, _round_up(m, 16))
    tn = min(128, n)                         # n in {64,128,256,512,1024}
    tk = k if k <= 4096 else 4096            # k in {48} ∪ {1024 * 2^i}
    return tm, tn, tk


def conv_matmul(patches, w_mat, *, with_stats, tm, tn, tk):
    M, K = patches.shape
    _, N = w_mat.shape
    nm, nn, nk = M // tm, N // tn, K // tk
    p_bf = patches.astype(jnp.bfloat16)
    w_bf = w_mat.astype(jnp.bfloat16)

    in_specs = [
        pl.BlockSpec((tm, tk), lambda mi, nj, k: (mi, k)),
        pl.BlockSpec((tk, tn), lambda mi, nj, k: (k, nj)),
    ]
    y_spec = pl.BlockSpec((tm, tn), lambda mi, nj, k: (mi, nj))
    cparams = pltpu.CompilerParams(
        dimension_semantics=("parallel", "parallel", "arbitrary"),
        vmem_limit_bytes=VMEM_LIMIT,
    )

    if with_stats:
        return pl.pallas_call(
            _conv_bn_matmul_kernel,
            out_shape=(
                jax.ShapeDtypeStruct((M, N), jnp.float32),
                jax.ShapeDtypeStruct((nm, 2, N), jnp.float32),
            ),
            grid_spec=pltpu.PrefetchScalarGridSpec(
                num_scalar_prefetch=0,
                grid=(nm, nn, nk),
                in_specs=in_specs,
                out_specs=(
                    y_spec,
                    pl.BlockSpec((1, 2, tn), lambda mi, nj, k: (mi, 0, nj)),
                ),
            ),
            compiler_params=cparams,
        )(p_bf, w_bf)

    return pl.pallas_call(
        _conv_act_matmul_kernel,
        out_shape=jax.ShapeDtypeStruct((M, N), jnp.float32),
        grid_spec=pltpu.PrefetchScalarGridSpec(
            num_scalar_prefetch=0,
            grid=(nm, nn, nk),
            in_specs=in_specs,
            out_specs=y_spec,
        ),
        compiler_params=cparams,
    )(p_bf, w_bf)


def bn_leakyrelu(z, stats, gamma, beta, m_valid, *, tm, tn):
    M, N = z.shape
    nm_total = stats.shape[0]
    nm, nn = M // tm, N // tn
    m_arr = jnp.array([m_valid], jnp.int32)
    return pl.pallas_call(
        _bn_act_kernel,
        out_shape=jax.ShapeDtypeStruct((M, N), jnp.float32),
        grid_spec=pltpu.PrefetchScalarGridSpec(
            num_scalar_prefetch=1,
            grid=(nm, nn),
            in_specs=[
                pl.BlockSpec((tm, tn), lambda mi, nj, m: (mi, nj)),
                pl.BlockSpec((nm_total, 2, tn), lambda mi, nj, m: (0, 0, nj)),
                pl.BlockSpec((1, tn), lambda mi, nj, m: (0, nj)),
                pl.BlockSpec((1, tn), lambda mi, nj, m: (0, nj)),
            ],
            out_specs=pl.BlockSpec((tm, tn), lambda mi, nj, m: (mi, nj)),
        ),
        compiler_params=pltpu.CompilerParams(
            dimension_semantics=("parallel", "parallel"),
            vmem_limit_bytes=VMEM_LIMIT,
        ),
    )(m_arr, z, stats, gamma, beta)


def linear(x, w, b):
    M0, K = x.shape
    nout = w.shape[1]
    NP = 128                                  # lane-dense padded output width
    x_p, m_valid = _pad_rows(x, 8)
    M = x_p.shape[0]
    w_p = jnp.pad(w, ((0, 0), (0, NP - nout)))
    b_p = jnp.pad(b, ((0, 0), (0, NP - nout)))

    if K <= 4096:
        tk = K
    elif K % 2048 == 0:
        tk = 2048
    elif K % 1024 == 0:
        tk = 1024
    else:
        tk = K
    nk = K // tk

    out = pl.pallas_call(
        _linear_kernel,
        out_shape=jax.ShapeDtypeStruct((M, NP), jnp.float32),
        grid_spec=pltpu.PrefetchScalarGridSpec(
            num_scalar_prefetch=0,
            grid=(nk,),
            in_specs=[
                pl.BlockSpec((M, tk), lambda k: (0, k)),
                pl.BlockSpec((tk, NP), lambda k: (k, 0)),
                pl.BlockSpec((1, NP), lambda k: (0, 0)),
            ],
            out_specs=pl.BlockSpec((M, NP), lambda k: (0, 0)),
        ),
        compiler_params=pltpu.CompilerParams(
            dimension_semantics=("arbitrary",),
            vmem_limit_bytes=VMEM_LIMIT,
        ),
    )(x_p.astype(jnp.bfloat16), w_p.astype(jnp.bfloat16), b_p)
    return out[:m_valid, :nout]


# ----------------------------------------------------------------------------
# Plain-JAX glue: NHWC im2col for conv 4x4 / stride 2 / pad 1
# ----------------------------------------------------------------------------
def im2col_nhwc(x):
    """x: (N, H, W, C) -> patches (N*OH*OW, 16*C), flattened (kh, kw, c)."""
    n, h, w, c = x.shape
    oh, ow = h // 2, w // 2
    xp = jnp.pad(x, ((0, 0), (1, 1), (1, 1), (0, 0)))
    cols = []
    for kh in range(4):
        for kw in range(4):
            cols.append(xp[:, kh:kh + 2 * oh:2, kw:kw + 2 * ow:2, :])
    p = jnp.stack(cols, axis=3)               # (N, OH, OW, 16, C)
    return p.reshape(n * oh * ow, 16 * c), (n, oh, ow)


def conv_layer(x_nhwc, layer):
    patches, (n, oh, ow) = im2col_nhwc(x_nhwc)
    M0, K = patches.shape
    N = layer["w"].shape[1]
    tm, tn, tk = _tiles(M0, N, K)
    patches, m_valid = _pad_rows(patches, tm)
    if layer["use_bn"]:
        z, stats = conv_matmul(patches, layer["w"], with_stats=True,
                               tm=tm, tn=tn, tk=tk)
        y = bn_leakyrelu(z, stats, layer["gamma"], layer["beta"], m_valid,
                         tm=tm, tn=tn)
    else:
        y = conv_matmul(patches, layer["w"], with_stats=False,
                        tm=tm, tn=tn, tk=tk)
    return y[:m_valid].reshape(n, oh, ow, N)  # stay NHWC between layers


# ----------------------------------------------------------------------------
# Model: parameters + forward
# ----------------------------------------------------------------------------
def init_params(key, input_height, input_width):
    channels = [3, 64, 128, 256, 512, 1024]
    use_bns = [False, True, True, True, False]
    convs = []
    for i in range(5):
        cin, cout = channels[i], channels[i + 1]
        key, k1, k2, k3 = jax.random.split(key, 4)
        # PyTorch conv weight (Cout, Cin, 4, 4) -> matmul rows in (kh, kw, ci)
        # order to match the NHWC im2col patch flattening.
        w = jax.random.normal(k1, (cout, cin, 4, 4), jnp.float32) * 0.05
        w_mat = jnp.transpose(w, (2, 3, 1, 0)).reshape(16 * cin, cout)
        gamma = 1.0 + 0.1 * jax.random.normal(k2, (1, cout), jnp.float32)
        beta = 0.1 * jax.random.normal(k3, (1, cout), jnp.float32)
        convs.append(dict(w=w_mat, gamma=gamma, beta=beta, use_bn=use_bns[i]))
    last_output_size = int(input_height / 2 ** 5 * (input_width / 2 ** 5))
    key, k1, k2 = jax.random.split(key, 3)
    lin_w = jax.random.normal(k1, (1024 * last_output_size, 1), jnp.float32) * 0.02
    lin_b = jax.random.normal(k2, (1, 1), jnp.float32) * 0.02
    return dict(convs=convs, lin_w=lin_w, lin_b=lin_b)


def cnn_discriminator_forward(img, params):
    x = jnp.transpose(img, (0, 2, 3, 1))      # NCHW -> NHWC once, up front
    for layer in params["convs"]:
        x = conv_layer(x, layer)
    n = x.shape[0]
    # Match PyTorch's img.reshape(size(0), -1) flatten order (NCHW).
    flat = jnp.transpose(x, (0, 3, 1, 2)).reshape(n, -1)
    return linear(flat, params["lin_w"], params["lin_b"])


if __name__ == "__main__":
    H = W = 32  # smallest size consistent with the 5 stride-2 downsamplings
    key = jax.random.PRNGKey(0)
    key, kimg = jax.random.split(key)
    img = jax.random.normal(kimg, (2, 3, H, W), jnp.float32)
    params = init_params(key, H, W)

    out = cnn_discriminator_forward(img, params)
    jax.block_until_ready(out)
    assert out.shape == (2, 1) and out.dtype == jnp.float32
    print("KERNEL_OK")
</pallas_src>

<mosaic_0001>
module attributes {stable_mosaic.version = 11 : i64} {
  func.func @_conv_act_matmul_kernel(%arg0: i32, %arg1: i32, %arg2: i32, %arg3: memref<256x48xbf16, #tpu.memory_space<vmem>>, %arg4: memref<48x64xbf16, #tpu.memory_space<vmem>>, %arg5: memref<256x64xf32, #tpu.memory_space<vmem>>) attributes {dimension_semantics = [#tpu.dimension_semantics<parallel>, #tpu.dimension_semantics<parallel>, #tpu.dimension_semantics<arbitrary>], iteration_bounds = array<i64: 2, 1, 1>, scalar_prefetch = 0 : i64, scratch_operands = 0 : i64, tpu.core_type = #tpu.core_type<tc>, window_params = [{transform_indices = @transform_0, window_bounds = array<i64: 256, 48>}, {transform_indices = @transform_1, window_bounds = array<i64: 48, 64>}, {transform_indices = @transform_2, window_bounds = array<i64: 256, 64>}]} {
    %c0_i32 = arith.constant 0 : i32
    %0 = arith.cmpi eq, %arg2, %c0_i32 : i32
    %1 = arith.extui %0 : i1 to i32
    %c0_i32_0 = arith.constant 0 : i32
    %2 = arith.cmpi ne, %1, %c0_i32_0 : i32
    scf.if %2 {
      %cst_10 = arith.constant 0.000000e+00 : f32
      %12 = vector.broadcast %cst_10 : f32 to vector<256x64xf32>
      %c0_11 = arith.constant 0 : index
      %c0_12 = arith.constant 0 : index
      %13 = vector.load %arg5[%c0_11, %c0_12] : memref<256x64xf32, #tpu.memory_space<vmem>>, vector<256x64xf32>
      tpu.vector_store %arg5[%c0_11, %c0_12], %12 {strides = array<i32>} : memref<256x64xf32, #tpu.memory_space<vmem>>, vector<256x64xf32>,
    } else {
    }
    %c0 = arith.constant 0 : index
    %c0_1 = arith.constant 0 : index
    %3 = vector.load %arg5[%c0, %c0_1] : memref<256x64xf32, #tpu.memory_space<vmem>>, vector<256x64xf32>
    %c0_2 = arith.constant 0 : index
    %c0_3 = arith.constant 0 : index
    %4 = vector.load %arg3[%c0_2, %c0_3] : memref<256x48xbf16, #tpu.memory_space<vmem>>, vector<256x48xbf16>
    %c0_4 = arith.constant 0 : index
    %c0_5 = arith.constant 0 : index
    %5 = vector.load %arg4[%c0_4, %c0_5] : memref<48x64xbf16, #tpu.memory_space<vmem>>, vector<48x64xbf16>
    %cst = arith.constant dense<0.000000e+00> : vector<256x64xf32>
    %6 = tpu.matmul %4, %5, %cst {dimension_numbers = #tpu.dot_dimension_numbers<[1], [0], [0], [1], [0, 0, 1, 1], [], []>} : vector<256x48xbf16>, vector<48x64xbf16>, vector<256x64xf32> -> vector<256x64xf32>
    %7 = arith.addf %3, %6 : vector<256x64xf32>
    %c0_6 = arith.constant 0 : index
    %c0_7 = arith.constant 0 : index
    %8 = vector.load %arg5[%c0_6, %c0_7] : memref<256x64xf32, #tpu.memory_space<vmem>>, vector<256x64xf32>
    tpu.vector_store %arg5[%c0_6, %c0_7], %7 {strides = array<i32>} : memref<256x64xf32, #tpu.memory_space<vmem>>, vector<256x64xf32>,
    %c0_i32_8 = arith.constant 0 : i32
    %9 = arith.cmpi eq, %arg2, %c0_i32_8 : i32
    %10 = arith.extui %9 : i1 to i32
    %c0_i32_9 = arith.constant 0 : i32
    %11 = arith.cmpi ne, %10, %c0_i32_9 : i32
    scf.if %11 {
      %c0_10 = arith.constant 0 : index
      %c0_11 = arith.constant 0 : index
      %12 = vector.load %arg5[%c0_10, %c0_11] : memref<256x64xf32, #tpu.memory_space<vmem>>, vector<256x64xf32>
      %cst_12 = arith.constant 0.000000e+00 : f32
      %13 = vector.broadcast %cst_12 : f32 to vector<256x64xf32>
      %14 = arith.cmpf oge, %12, %13 : vector<256x64xf32>
      %cst_13 = arith.constant 2.000000e-01 : f32
      %15 = vector.broadcast %cst_13 : f32 to vector<256x64xf32>
      %16 = arith.mulf %15, %12 : vector<256x64xf32>
      %17 = arith.select %14, %12, %16 : vector<256x64xi1>, vector<256x64xf32>
      %c0_14 = arith.constant 0 : index
      %c0_15 = arith.constant 0 : index
      %18 = vector.load %arg5[%c0_14, %c0_15] : memref<256x64xf32, #tpu.memory_space<vmem>>, vector<256x64xf32>
      tpu.vector_store %arg5[%c0_14, %c0_15], %17 {strides = array<i32>} : memref<256x64xf32, #tpu.memory_space<vmem>>, vector<256x64xf32>,
    } else {
    }
    return
  }
  func.func @transform_0(%arg0: i32, %arg1: i32, %arg2: i32) -> (i32, i32) {
    %c0_i32 = arith.constant 0 : i32
    return %arg0, %arg2 : i32, i32
  }
  func.func @transform_1(%arg0: i32, %arg1: i32, %arg2: i32) -> (i32, i32) {
    %c0_i32 = arith.constant 0 : i32
    return %arg2, %arg1 : i32, i32
  }
  func.func @transform_2(%arg0: i32, %arg1: i32, %arg2: i32) -> (i32, i32) {
    %c0_i32 = arith.constant 0 : i32
    return %arg0, %arg1 : i32, i32
  }
}

</mosaic_0001>

<bundles_post_ra>
// kernel: tpu_custom_call.1
= control target key start
LH: loop header
LB: loop body
LE: loop exit
PB: predicated region body
PF: predicated region fallthrough
CT: control target
= control target key end

     0   :  { %s1155_s9 = smov 0   ;;  %s1157_s10 = smov 0   ;;  %s1497_s0 = inlined_call_operand.vmem [shape: bf16[512,48], index: 0, kind: input, shape index: {}]   ;;  %s1498_s1 = inlined_call_operand.vmem [shape: bf16[48,64], index: 1, kind: input, shape index: {}]   ;;  %s1499_s2 = inlined_call_operand.vmem [shape: f32[512,64], index: 2, kind: output, shape index: {}]  }
   0x1   :  { %s1159_s11 = smov 0  }
   0x2 LB: > { %s31_s12 = sadd.s32 1, %s1133_s10  ;;  %p966_p0 = scmp.ge.s32.totalorder %s1137_s11, 1  ;;  %s1137_s11 = sphi %s1159_s11, %s12_s11   ;;  %s1133_s10 = sphi %s1157_s10, %s1501_s10   ;;  %s1129_s9 = sphi %s1155_s9, %s1500_s9  }
   0x3   : > { %p33_p1 = scmp.ge.s32.totalorder %s31_s12, 2  ;;  %p155_p2 = scmp.lt.s32.totalorder %s1137_s11, 3 }
   0x5   : > { %s1503_s12 = smov (%p33_p1, %s31_s12), 0  ;;  %p156_p3 = pnand %p966_p0, %p155_p2 }
   0x6   : > { %v1096_v0 = vld [vmem:[%s1498_s1] sm:$0xff] (!%p156_p3)   ;;  %s967_s15 = sshll.u32 (!%p156_p3), %s1129_s9, 5  ;;  %v1097_v1 = vld [vmem:[%s1498_s1 + $0x8] sm:$0xff] (!%p156_p3)   ;;  %v1098_v2 = vld [vmem:[%s1498_s1 + $0x10] sm:$0xff] (!%p156_p3)   ;;  %vm223_vm0 = vcmask (!%p156_p3), 523264   ;;  %vm424_vm1 = vcmask (!%p156_p3), 392192  }
   0x7   : > { %159 = sbr.rel (%p156_p3) target bundleno = 280 (0x118), region = 28  ;;  %p192_p4 = scmp.lt.s32.totalorder (!%p156_p3), %s967_s15, 63  ;;  %1027 = vmatprep.subr.bf16.mxu0 (!%p156_p3), %v1096_v0  ;;  %1065 = vmatprep.subr.bf16.mxu1 (!%p156_p3), %v1096_v0  ;;  %v1139_v4 = vmov (!%p156_p3), 0.0  }
   0x8   : > { %1028 = vmatpush3.bf16.msra.mxu0 (!%p156_p3), %v1096_v0  ;;  %1068 = vmatpush3.bf16.msra.mxu1 (!%p156_p3), %v1096_v0 }
   0x9   : > { %1029 = vmatprep.subr.bf16.mxu0 (!%p156_p3), %v1097_v1  ;;  %1066 = vmatprep.subr.bf16.mxu1 (!%p156_p3), %v1097_v1 }
   0xc   : > { %1030 = vmatpush3.bf16.msra.mxu0 (!%p156_p3), %v1097_v1  ;;  %1069 = vmatpush3.bf16.msra.mxu1 (!%p156_p3), %v1097_v1 }
   0xd   : > { %1031 = vmatprep.subr.bf16.mxu0 (!%p156_p3), %v1098_v2  ;;  %1067 = vmatprep.subr.bf16.mxu1 (!%p156_p3), %v1098_v2 }
   0xe   : > { %s1505_s15 = smov (!%p192_p4, %s967_s15), 63 }
   0xf   : > { %s968_s20 = sshll.u32 %s1505_s15, 2  ;;  %s970_s21 = sshll.u32 %s1505_s15, 3 }
  0x10   : > { %s1185_s24 = scalar_lea.vmem %s1497_s0, %s968_s20  ;;  %s1190_s27 = scalar_lea.vmem %s1499_s2, %s970_s21  ;;  %1032 = vmatpush3.bf16.msra.mxu0 %v1098_v2  ;;  %1070 = vmatpush3.bf16.msra.mxu1 %v1098_v2 }
  0x11   : > { %v1099_v3 = vld [vmem:[%s1185_s24] sm:$0xff]   ;;  %226 = vst.msk [vmem:[%s1190_s27 + $0x10] sm:$0xff] %vm223_vm0, %v1139_v4  ;;  %224 = vst.msk [vmem:[%s1190_s27] sm:$0xff] %vm223_vm0, %v1139_v4  ;;  %v1101_v6 = vld [vmem:[%s1185_s24 + $0x8] sm:$0xff]  }
  0x12   : > { %225 = vst.msk [vmem:[%s1190_s27 + $0x8] sm:$0xff] %vm223_vm0, %v1139_v4  ;;  %227 = vst.msk [vmem:[%s1190_s27 + $0x18] sm:$0xff] %vm223_vm0, %v1139_v4  ;;  %v1100_v5 = vld [vmem:[%s1185_s24 + $0x40] sm:$0xff]   ;;  %1033 = vmatprep.mubr.msk.bf16.mxu0 %vm424_vm1, %v1099_v3  ;;  %v1102_v7 = vld [vmem:[%s1185_s24 + $0x48] sm:$0xff]  }
  0x13   : > { %228 = vst.msk [vmem:[%s1190_s27 + $0x20] sm:$0xff] %vm223_vm0, %v1139_v4  ;;  %229 = vst.msk [vmem:[%s1190_s27 + $0x28] sm:$0xff] %vm223_vm0, %v1139_v4  ;;  %1049 = vmatprep.mubr.msk.bf16.mxu1 %vm424_vm1, %v1100_v5  ;;  %v1103_v8 = vld [vmem:[%s1185_s24 + $0x10] sm:$0xff]   ;;  %1034 = vmatmul.mubr.msk.bf16.vlgmr.msra.gmra.mrb[0].mxu0 %vm424_vm1, %v1101_v6  ;;  %v1105_v10 = vld [vmem:[%s1185_s24 + $0x18] sm:$0xff]  }
  0x14   : > { %230 = vst.msk [vmem:[%s1190_s27 + $0x30] sm:$0xff] %vm223_vm0, %v1139_v4  ;;  %231 = vst.msk [vmem:[%s1190_s27 + $0x38] sm:$0xff] %vm223_vm0, %v1139_v4  ;;  %v1104_v9 = vld [vmem:[%s1185_s24 + $0x50] sm:$0xff]   ;;  %1050 = vmatmul.mubr.msk.bf16.vlgmr.msra.gmra.mrb[0].mxu1 %vm424_vm1, %v1102_v7  ;;  %1037 = vmatprep.mubr.msk.bf16.mxu0 %vm424_vm1, %v1103_v8  ;;  %v1106_v11 = vld [vmem:[%s1185_s24 + $0x58] sm:$0xff]  }
  0x15   : > { %232 = vst.msk [vmem:[%s1190_s27 + $0x40] sm:$0xff] %vm223_vm0, %v1139_v4  ;;  %233 = vst.msk [vmem:[%s1190_s27 + $0x48] sm:$0xff] %vm223_vm0, %v1139_v4  ;;  %1053 = vmatprep.mubr.msk.bf16.mxu1 %vm424_vm1, %v1104_v9  ;;  %v1107_v12 = vld [vmem:[%s1185_s24 + $0x20] sm:$0xff]   ;;  %v1109_v14 = vld [vmem:[%s1185_s24 + $0x28] sm:$0xff]  }
  0x16   : > { %234 = vst.msk [vmem:[%s1190_s27 + $0x50] sm:$0xff] %vm223_vm0, %v1139_v4  ;;  %235 = vst.msk [vmem:[%s1190_s27 + $0x58] sm:$0xff] %vm223_vm0, %v1139_v4  ;;  %v1108_v13 = vld [vmem:[%s1185_s24 + $0x60] sm:$0xff]   ;;  %v1110_v15 = vld [vmem:[%s1185_s24 + $0x68] sm:$0xff]  }
  0x17   : > { %236 = vst.msk [vmem:[%s1190_s27 + $0x60] sm:$0xff] %vm223_vm0, %v1139_v4  ;;  %237 = vst.msk [vmem:[%s1190_s27 + $0x68] sm:$0xff] %vm223_vm0, %v1139_v4  ;;  %v1111_v16 = vld [vmem:[%s1185_s24 + $0x30] sm:$0xff]   ;;  %v1113_v18 = vld [vmem:[%s1185_s24 + $0x38] sm:$0xff]  }
  0x18   : > { %238 = vst.msk [vmem:[%s1190_s27 + $0x70] sm:$0xff] %vm223_vm0, %v1139_v4  ;;  %239 = vst.msk [vmem:[%s1190_s27 + $0x78] sm:$0xff] %vm223_vm0, %v1139_v4  ;;  %v1112_v17 = vld [vmem:[%s1185_s24 + $0x70] sm:$0xff]   ;;  %v1114_v19 = vld [vmem:[%s1185_s24 + $0x78] sm:$0xff]  }
  0x19   : > { %240 = vst.msk [vmem:[%s1190_s27 + $0x80] sm:$0xff] %vm223_vm0, %v1139_v4  ;;  %241 = vst.msk [vmem:[%s1190_s27 + $0x88] sm:$0xff] %vm223_vm0, %v1139_v4  ;;  %v258_v20 = vld [vmem:[%s1190_s27 + $0x10] sm:$0xff]  ;;  %v256_v22 = vld [vmem:[%s1190_s27] sm:$0xff] }
  0x1a   : > { %242 = vst.msk [vmem:[%s1190_s27 + $0x90] sm:$0xff] %vm223_vm0, %v1139_v4  ;;  %243 = vst.msk [vmem:[%s1190_s27 + $0x98] sm:$0xff] %vm223_vm0, %v1139_v4  ;;  %v259_v26 = vld [vmem:[%s1190_s27 + $0x18] sm:$0xff]  ;;  %v257_v32 = vld [vmem:[%s1190_s27 + $0x8] sm:$0xff] }
  0x1b   : > { %244 = vst.msk [vmem:[%s1190_s27 + $0xa0] sm:$0xff] %vm223_vm0, %v1139_v4  ;;  %245 = vst.msk [vmem:[%s1190_s27 + $0xa8] sm:$0xff] %vm223_vm0, %v1139_v4  ;;  %1038 = vmatmul.mubr.msk.bf16.gmra.mrb[4].mxu0 %vm424_vm1, %v1105_v10  ;;  %v262_v44 = vld [vmem:[%s1190_s27 + $0x30] sm:$0xff]  ;;  %v260_v46 = vld [vmem:[%s1190_s27 + $0x20] sm:$0xff] }
  0x1c   : > { %246 = vst.msk [vmem:[%s1190_s27 + $0xb0] sm:$0xff] %vm223_vm0, %v1139_v4  ;;  %247 = vst.msk [vmem:[%s1190_s27 + $0xb8] sm:$0xff] %vm223_vm0, %v1139_v4  ;;  %1054 = vmatmul.mubr.msk.bf16.gmra.mrb[4].mxu1 %vm424_vm1, %v1106_v11  ;;  %1041 = vmatprep.mubr.msk.bf16.mxu0 %vm424_vm1, %v1107_v12  ;;  %v263_v54 = vld [vmem:[%s1190_s27 + $0x38] sm:$0xff]  ;;  %v261_v5 = vld [vmem:[%s1190_s27 + $0x28] sm:$0xff] }
  0x1d   : > { %248 = vst.msk [vmem:[%s1190_s27 + $0xc0] sm:$0xff] %vm223_vm0, %v1139_v4  ;;  %249 = vst.msk [vmem:[%s1190_s27 + $0xc8] sm:$0xff] %vm223_vm0, %v1139_v4  ;;  %1057 = vmatprep.mubr.msk.bf16.mxu1 %vm424_vm1, %v1108_v13 }
  0x1e   : > { %250 = vst.msk [vmem:[%s1190_s27 + $0xd0] sm:$0xff] %vm223_vm0, %v1139_v4  ;;  %251 = vst.msk [vmem:[%s1190_s27 + $0xd8] sm:$0xff] %vm223_vm0, %v1139_v4 }
  0x1f   : > { %252 = vst.msk [vmem:[%s1190_s27 + $0xe0] sm:$0xff] %vm223_vm0, %v1139_v4  ;;  %253 = vst.msk [vmem:[%s1190_s27 + $0xe8] sm:$0xff] %vm223_vm0, %v1139_v4 }
  0x20   : > { %254 = vst.msk [vmem:[%s1190_s27 + $0xf0] sm:$0xff] %vm223_vm0, %v1139_v4  ;;  %255 = vst.msk [vmem:[%s1190_s27 + $0xf8] sm:$0xff] %vm223_vm0, %v1139_v4  ;;  %v272_v23 = vld [vmem:[%s1190_s27 + $0x80] sm:$0xff]  ;;  %v273_v33 = vld [vmem:[%s1190_s27 + $0x88] sm:$0xff] }
  0x21   : > { %v274_v21 = vld [vmem:[%s1190_s27 + $0x90] sm:$0xff]  ;;  %v275_v27 = vld [vmem:[%s1190_s27 + $0x98] sm:$0xff] }
  0x22   : > { %v276_v47 = vld [vmem:[%s1190_s27 + $0xa0] sm:$0xff]  ;;  %v277_v7 = vld [vmem:[%s1190_s27 + $0xa8] sm:$0xff] }
  0x23   : > { %1042 = vmatmul.mubr.msk.bf16.gmra.mrb[8].mxu0 %vm424_vm1, %v1109_v14  ;;  %v278_v45 = vld [vmem:[%s1190_s27 + $0xb0] sm:$0xff]  ;;  %v279_v55 = vld [vmem:[%s1190_s27 + $0xb8] sm:$0xff] }
  0x24   : > { %1058 = vmatmul.mubr.msk.bf16.gmra.mrb[8].mxu1 %vm424_vm1, %v1110_v15  ;;  %1045 = vmatprep.mubr.msk.bf16.mxu0 %vm424_vm1, %v1111_v16  ;;  %v266_v15 = vld [vmem:[%s1190_s27 + $0x50] sm:$0xff] }
  0x25   : > { %1061 = vmatprep.mubr.msk.bf16.mxu1 %vm424_vm1, %v1112_v17 }
  0x2b   : > { %1046 = vmatmul.mubr.msk.bf16.gmra.mrb[12].mxu0 %vm424_vm1, %v1113_v18 }
  0x2c   : > { %1062 = vmatmul.mubr.msk.bf16.gmra.mrb[12].mxu1 %vm424_vm1, %v1114_v19 }
  0xe6   : > { %v1035_v24 = vpop.f32.mrb[0].mxu0 }
  0xe7   : > { %v1051_v25 = vpop.f32.mrb[0].mxu1  ;;  %v636_v28 = vadd.f32 %v1035_v24, %v258_v20  ;;  %v507_v30 = vpop.f32.mrb[1].mxu0  ;;  %v282_v20 = vld [vmem:[%s1190_s27 + $0xd0] sm:$0xff] }
  0xe8   : > { %v652_v29 = vadd.f32 %v1051_v25, %v274_v21  ;;  %v571_v31 = vpop.f32.mrb[1].mxu1  ;;  %v634_v34 = vadd.f32 %v507_v30, %v256_v22  ;;  %v1036_v36 = vpop.f32.mrb[2].mxu0  ;;  %v264_v21 = vld [vmem:[%s1190_s27 + $0x40] sm:$0xff] }
  0xe9   : > { %v650_v35 = vadd.f32 %v571_v31, %v272_v23  ;;  %v1052_v37 = vpop.f32.mrb[2].mxu1  ;;  %669 = vst.msk [vmem:[%s1190_s27 + $0x10] sm:$0xff] %vm223_vm0, %v636_v28  ;;  %v637_v38 = vadd.f32 %v1036_v36, %v259_v26  ;;  %v510_v40 = vpop.f32.mrb[3].mxu0 }
  0xea   : > { %685 = vst.msk [vmem:[%s1190_s27 + $0x90] sm:$0xff] %vm223_vm0, %v652_v29  ;;  %v653_v39 = vadd.f32 %v1052_v37, %v275_v27  ;;  %v574_v41 = vpop.f32.mrb[3].mxu1  ;;  %667 = vst.msk [vmem:[%s1190_s27] sm:$0xff] %vm223_vm0, %v634_v34  ;;  %v635_v42 = vadd.f32 %v510_v40, %v257_v32  ;;  %v280_v32 = vld [vmem:[%s1190_s27 + $0xc0] sm:$0xff]  ;;  %v267_v34 = vld [vmem:[%s1190_s27 + $0x58] sm:$0xff] }
  0xeb   : > { %683 = vst.msk [vmem:[%s1190_s27 + $0x80] sm:$0xff] %vm223_vm0, %v650_v35  ;;  %v651_v43 = vadd.f32 %v574_v41, %v273_v33  ;;  %670 = vst.msk [vmem:[%s1190_s27 + $0x18] sm:$0xff] %vm223_vm0, %v637_v38 }
  0xec   : > { %686 = vst.msk [vmem:[%s1190_s27 + $0x98] sm:$0xff] %vm223_vm0, %v653_v39  ;;  %668 = vst.msk [vmem:[%s1190_s27 + $0x8] sm:$0xff] %vm223_vm0, %v635_v42  ;;  %v283_v42 = vld [vmem:[%s1190_s27 + $0xd8] sm:$0xff] }
  0xed   : > { %684 = vst.msk [vmem:[%s1190_s27 + $0x88] sm:$0xff] %vm223_vm0, %v651_v43 }
  0xee   : > { %v1039_v48 = vpop.f32.mrb[4].mxu0 }
  0xef   : > { %v1055_v49 = vpop.f32.mrb[4].mxu1  ;;  %v640_v50 = vadd.f32 %v1039_v48, %v262_v44  ;;  %v523_v52 = vpop.f32.mrb[5].mxu0  ;;  %v265_v48 = vld [vmem:[%s1190_s27 + $0x48] sm:$0xff] }
  0xf0   : > { %v656_v51 = vadd.f32 %v1055_v49, %v278_v45  ;;  %v587_v53 = vpop.f32.mrb[5].mxu1  ;;  %v704_v56 = vld [vmem:[%s1190_s27 + $0x10] sm:$0xff]  ;;  %v638_v58 = vadd.f32 %v523_v52, %v260_v46  ;;  %v1040_v60 = vpop.f32.mrb[6].mxu0  ;;  %v281_v49 = vld [vmem:[%s1190_s27 + $0xc8] sm:$0xff] }
  0xf1   : > { %v720_v57 = vld [vmem:[%s1190_s27 + $0x90] sm:$0xff]  ;;  %v654_v59 = vadd.f32 %v587_v53, %v276_v47  ;;  %v1056_v61 = vpop.f32.mrb[6].mxu1  ;;  %vm736_vm2 = vcmp.ge.f32.partialorder %v704_v56, 0.0  ;;  %v768_v62 = vmul.f32 0.2, %v704_v56  ;;  %673 = vst.msk [vmem:[%s1190_s27 + $0x30] sm:$0xff] %vm223_vm0, %v640_v50  ;;  %v641_v3 = vadd.f32 %v1040_v60, %v263_v54 }
  0xf2   : > { %vm752_vm3 = vcmp.ge.f32.partialorder %v720_v57, 0.0  ;;  %v784_v63 = vmul.f32 0.2, %v720_v57  ;;  %689 = vst.msk [vmem:[%s1190_s27 + $0xb0] sm:$0xff] %vm223_vm0, %v656_v51  ;;  %v702_v0 = vld [vmem:[%s1190_s27] sm:$0xff]  ;;  %v705_v2 = vld [vmem:[%s1190_s27 + $0x18] sm:$0xff]  ;;  %v657_v4 = vadd.f32 %v1056_v61, %v279_v55 }
  0xf3   : > { %v718_v1 = vld [vmem:[%s1190_s27 + $0x80] sm:$0xff]  ;;  %671 = vst.msk [vmem:[%s1190_s27 + $0x20] sm:$0xff] %vm223_vm0, %v638_v58  ;;  %687 = vst.msk [vmem:[%s1190_s27 + $0xa0] sm:$0xff] %vm223_vm0, %v654_v59  ;;  %v526_v6 = vpop.f32.mrb[7].mxu0  ;;  %v590_v8 = vpop.f32.mrb[7].mxu1  ;;  %v800_v9 = vsel %vm736_vm2, %v704_v56, %v768_v62  ;;  %vm734_vm4 = vcmp.ge.f32.partialorder %v702_v0, 0.0 }
  0xf4   : > { %v816_v10 = vsel %vm752_vm3, %v720_v57, %v784_v63  ;;  %v766_v11 = vmul.f32 0.2, %v702_v0  ;;  %v721_v12 = vld [vmem:[%s1190_s27 + $0x98] sm:$0xff]  ;;  %v703_v13 = vld [vmem:[%s1190_s27 + $0x8] sm:$0xff]  ;;  %832 = vst.msk [vmem:[%s1190_s27 + $0x10] sm:$0xff] %vm223_vm0, %v800_v9  ;;  %vm750_vm5 = vcmp.ge.f32.partialorder %v718_v1, 0.0  ;;  %v639_v29 = vadd.f32 %v526_v6, %v261_v5 }
  0xf5   : > { %v719_v14 = vld [vmem:[%s1190_s27 + $0x88] sm:$0xff]  ;;  %848 = vst.msk [vmem:[%s1190_s27 + $0x90] sm:$0xff] %vm223_vm0, %v816_v10  ;;  %v782_v16 = vmul.f32 0.2, %v718_v1  ;;  %vm737_vm6 = vcmp.ge.f32.partialorder %v705_v2, 0.0  ;;  %674 = vst.msk [vmem:[%s1190_s27 + $0x38] sm:$0xff] %vm223_vm0, %v641_v3  ;;  %v655_v30 = vadd.f32 %v590_v8, %v277_v7 }
  0xf6   : > { %v769_v17 = vmul.f32 0.2, %v705_v2  ;;  %690 = vst.msk [vmem:[%s1190_s27 + $0xb8] sm:$0xff] %vm223_vm0, %v657_v4  ;;  %v798_v18 = vsel %vm734_vm4, %v702_v0, %v766_v11  ;;  %vm753_vm7 = vcmp.ge.f32.partialorder %v721_v12, 0.0  ;;  %v785_v19 = vmul.f32 0.2, %v721_v12 }
  0xf7   : > { %vm735_vm8 = vcmp.ge.f32.partialorder %v703_v13, 0.0  ;;  %830 = vst.msk [vmem:[%s1190_s27] sm:$0xff] %vm223_vm0, %v798_v18  ;;  %v814_v22 = vsel %vm750_vm5, %v718_v1, %v782_v16  ;;  %v767_v24 = vmul.f32 0.2, %v703_v13  ;;  %vm751_vm9 = vcmp.ge.f32.partialorder %v719_v14, 0.0  ;;  %v1043_v25 = vpop.f32.mrb[8].mxu0 }
  0xf8   : > { %v801_v23 = vsel %vm737_vm6, %v705_v2, %v769_v17  ;;  %v1059_v26 = vpop.f32.mrb[8].mxu1  ;;  %846 = vst.msk [vmem:[%s1190_s27 + $0x80] sm:$0xff] %vm223_vm0, %v814_v22  ;;  %v817_v27 = vsel %vm753_vm7, %v721_v12, %v785_v19  ;;  %v783_v28 = vmul.f32 0.2, %v719_v14  ;;  %v539_v31 = vpop.f32.mrb[9].mxu0  ;;  %v708_v36 = vld [vmem:[%s1190_s27 + $0x30] sm:$0xff]  ;;  %v644_v38 = vadd.f32 %v1043_v25, %v266_v15 }
  0xf9   : > { %833 = vst.msk [vmem:[%s1190_s27 + $0x18] sm:$0xff] %vm223_vm0, %v801_v23  ;;  %v603_v33 = vpop.f32.mrb[9].mxu1  ;;  %849 = vst.msk [vmem:[%s1190_s27 + $0x98] sm:$0xff] %vm223_vm0, %v817_v27  ;;  %v799_v35 = vsel %vm735_vm8, %v703_v13, %v767_v24  ;;  %v724_v37 = vld [vmem:[%s1190_s27 + $0xb0] sm:$0xff]  ;;  %v660_v39 = vadd.f32 %v1059_v26, %v282_v20  ;;  %v642_v40 = vadd.f32 %v539_v31, %v264_v21  ;;  %v1044_v41 = vpop.f32.mrb[10].mxu0  ;;  %vm740_vm10 = vcmp.ge.f32.partialorder %v708_v36, 0.0 }
  0xfa   : > { %v1060_v43 = vpop.f32.mrb[10].mxu1  ;;  %831 = vst.msk [vmem:[%s1190_s27 + $0x8] sm:$0xff] %vm223_vm0, %v799_v35  ;;  %v815_v44 = vsel %vm751_vm9, %v719_v14, %v783_v28  ;;  %v772_v45 = vmul.f32 0.2, %v708_v36  ;;  %vm756_vm11 = vcmp.ge.f32.partialorder %v724_v37, 0.0  ;;  %v706_v46 = vld [vmem:[%s1190_s27 + $0x20] sm:$0xff]  ;;  %v658_v56 = vadd.f32 %v603_v33, %v280_v32 }
  0xfb   : > { %v722_v47 = vld [vmem:[%s1190_s27 + $0xa0] sm:$0xff]  ;;  %672 = vst.msk [vmem:[%s1190_s27 + $0x28] sm:$0xff] %vm223_vm0, %v639_v29  ;;  %688 = vst.msk [vmem:[%s1190_s27 + $0xa8] sm:$0xff] %vm223_vm0, %v655_v30  ;;  %v788_v50 = vmul.f32 0.2, %v724_v37  ;;  %vm738_vm12 = vcmp.ge.f32.partialorder %v706_v46, 0.0  ;;  %v645_v57 = vadd.f32 %v1044_v41, %v267_v34  ;;  %v661_v3 = vadd.f32 %v1060_v43, %v283_v42 }
  0xfc   : > { %847 = vst.msk [vmem:[%s1190_s27 + $0x88] sm:$0xff] %vm223_vm0, %v815_v44  ;;  %v770_v51 = vmul.f32 0.2, %v706_v46  ;;  %vm754_vm13 = vcmp.ge.f32.partialorder %v722_v47, 0.0  ;;  %677 = vst.msk [vmem:[%s1190_s27 + $0x50] sm:$0xff] %vm223_vm0, %v644_v38  ;;  %v804_v52 = vsel %vm740_vm10, %v708_v36, %v772_v45  ;;  %v709_v54 = vld [vmem:[%s1190_s27 + $0x38] sm:$0xff] }
  0xfd   : > { %693 = vst.msk [vmem:[%s1190_s27 + $0xd0] sm:$0xff] %vm223_vm0, %v660_v39  ;;  %675 = vst.msk [vmem:[%s1190_s27 + $0x40] sm:$0xff] %vm223_vm0, %v642_v40  ;;  %v786_v53 = vmul.f32 0.2, %v722_v47  ;;  %v725_v55 = vld [vmem:[%s1190_s27 + $0xb8] sm:$0xff]  ;;  %v542_v58 = vpop.f32.mrb[11].mxu0  ;;  %v820_v60 = vsel %vm756_vm11, %v724_v37, %v788_v50 }
  0xfe   : > { %v606_v59 = vpop.f32.mrb[11].mxu1  ;;  %836 = vst.msk [vmem:[%s1190_s27 + $0x30] sm:$0xff] %vm223_vm0, %v804_v52  ;;  %v802_v61 = vsel %vm738_vm12, %v706_v46, %v770_v51  ;;  %vm741_vm14 = vcmp.ge.f32.partialorder %v709_v54, 0.0  ;;  %v773_v62 = vmul.f32 0.2, %v709_v54  ;;  %v270_v63 = vld [vmem:[%s1190_s27 + $0x70] sm:$0xff]  ;;  %v643_v7 = vadd.f32 %v542_v58, %v265_v48 }
  0xff   : > { %v286_v0 = vld [vmem:[%s1190_s27 + $0xf0] sm:$0xff]  ;;  %852 = vst.msk [vmem:[%s1190_s27 + $0xb0] sm:$0xff] %vm223_vm0, %v820_v60  ;;  %834 = vst.msk [vmem:[%s1190_s27 + $0x20] sm:$0xff] %vm223_vm0, %v802_v61  ;;  %v818_v1 = vsel %vm754_vm13, %v722_v47, %v786_v53  ;;  %vm757_vm15 = vcmp.ge.f32.partialorder %v725_v55, 0.0  ;;  %v789_v2 = vmul.f32 0.2, %v725_v55  ;;  %v659_v8 = vadd.f32 %v606_v59, %v281_v49 }
 0x100   : > { %691 = vst.msk [vmem:[%s1190_s27 + $0xc0] sm:$0xff] %vm223_vm0, %v658_v56  ;;  %678 = vst.msk [vmem:[%s1190_s27 + $0x58] sm:$0xff] %vm223_vm0, %v645_v57  ;;  %v268_v4 = vld [vmem:[%s1190_s27 + $0x60] sm:$0xff]  ;;  %v805_v6 = vsel %vm741_vm14, %v709_v54, %v773_v62  ;;  %v1047_v9 = vpop.f32.mrb[12].mxu0  ;;  %v1063_v10 = vpop.f32.mrb[12].mxu1  ;;  %v271_v16 = vld [vmem:[%s1190_s27 + $0x78] sm:$0xff] }
 0x101   : > { %v284_v5 = vld [vmem:[%s1190_s27 + $0xe0] sm:$0xff]  ;;  %850 = vst.msk [vmem:[%s1190_s27 + $0xa0] sm:$0xff] %vm223_vm0, %v818_v1  ;;  %837 = vst.msk [vmem:[%s1190_s27 + $0x38] sm:$0xff] %vm223_vm0, %v805_v6  ;;  %v821_v11 = vsel %vm757_vm15, %v725_v55, %v789_v2  ;;  %v648_v12 = vadd.f32 %v1047_v9, %v270_v63  ;;  %v664_v13 = vadd.f32 %v1063_v10, %v286_v0  ;;  %v555_v14 = vpop.f32.mrb[13].mxu0  ;;  %v619_v15 = vpop.f32.mrb[13].mxu1  ;;  %v287_v17 = vld [vmem:[%s1190_s27 + $0xf8] sm:$0xff] }
 0x102   : > { %694 = vst.msk [vmem:[%s1190_s27 + $0xd8] sm:$0xff] %vm223_vm0, %v661_v3  ;;  %853 = vst.msk [vmem:[%s1190_s27 + $0xb8] sm:$0xff] %vm223_vm0, %v821_v11  ;;  %v707_v18 = vld [vmem:[%s1190_s27 + $0x28] sm:$0xff]  ;;  %v646_v20 = vadd.f32 %v555_v14, %v268_v4  ;;  %v662_v21 = vadd.f32 %v619_v15, %v284_v5  ;;  %v1048_v22 = vpop.f32.mrb[14].mxu0  ;;  %v1064_v23 = vpop.f32.mrb[14].mxu1 }
 0x103   : > { %v723_v19 = vld [vmem:[%s1190_s27 + $0xa8] sm:$0xff]  ;;  %676 = vst.msk [vmem:[%s1190_s27 + $0x48] sm:$0xff] %vm223_vm0, %v643_v7  ;;  %692 = vst.msk [vmem:[%s1190_s27 + $0xc8] sm:$0xff] %vm223_vm0, %v659_v8  ;;  %vm739_vm1 = vcmp.ge.f32.partialorder %v707_v18, 0.0  ;;  %v771_v26 = vmul.f32 0.2, %v707_v18  ;;  %v649_v31 = vadd.f32 %v1048_v22, %v271_v16  ;;  %v665_v32 = vadd.f32 %v1064_v23, %v287_v17 }
 0x104   : > { %v269_v24 = vld [vmem:[%s1190_s27 + $0x68] sm:$0xff]  ;;  %vm755_vm2 = vcmp.ge.f32.partialorder %v723_v19, 0.0  ;;  %v787_v27 = vmul.f32 0.2, %v723_v19  ;;  %681 = vst.msk [vmem:[%s1190_s27 + $0x70] sm:$0xff] %vm223_vm0, %v648_v12  ;;  %697 = vst.msk [vmem:[%s1190_s27 + $0xf0] sm:$0xff] %vm223_vm0, %v664_v13 }
 0x105   : > { %v285_v25 = vld [vmem:[%s1190_s27 + $0xe8] sm:$0xff]  ;;  %v712_v28 = vld [vmem:[%s1190_s27 + $0x50] sm:$0xff]  ;;  %v710_v30 = vld [vmem:[%s1190_s27 + $0x40] sm:$0xff]  ;;  %679 = vst.msk [vmem:[%s1190_s27 + $0x60] sm:$0xff] %vm223_vm0, %v646_v20  ;;  %v558_v33 = vpop.f32.mrb[15].mxu0  ;;  %v622_v34 = vpop.f32.mrb[15].mxu1  ;;  %v803_v35 = vsel %vm739_vm1, %v707_v18, %v771_v26 }
 0x106   : > { %v728_v29 = vld [vmem:[%s1190_s27 + $0xd0] sm:$0xff]  ;;  %695 = vst.msk [vmem:[%s1190_s27 + $0xe0] sm:$0xff] %vm223_vm0, %v662_v21  ;;  %v819_v36 = vsel %vm755_vm2, %v723_v19, %v787_v27  ;;  %vm744_vm3 = vcmp.ge.f32.partialorder %v712_v28, 0.0  ;;  %v776_v37 = vmul.f32 0.2, %v712_v28  ;;  %835 = vst.msk [vmem:[%s1190_s27 + $0x28] sm:$0xff] %vm223_vm0, %v803_v35  ;;  %v647_v43 = vadd.f32 %v558_v33, %v269_v24 }
 0x107   : > { %851 = vst.msk [vmem:[%s1190_s27 + $0xa8] sm:$0xff] %vm223_vm0, %v819_v36  ;;  %vm760_vm4 = vcmp.ge.f32.partialorder %v728_v29, 0.0  ;;  %v792_v38 = vmul.f32 0.2, %v728_v29  ;;  %vm742_vm5 = vcmp.ge.f32.partialorder %v710_v30, 0.0  ;;  %682 = vst.msk [vmem:[%s1190_s27 + $0x78] sm:$0xff] %vm223_vm0, %v649_v31  ;;  %v663_v44 = vadd.f32 %v622_v34, %v285_v25 }
 0x108   : > { %v774_v39 = vmul.f32 0.2, %v710_v30  ;;  %698 = vst.msk [vmem:[%s1190_s27 + $0xf8] sm:$0xff] %vm223_vm0, %v665_v32  ;;  %v808_v40 = vsel %vm744_vm3, %v712_v28, %v776_v37  ;;  %v726_v41 = vld [vmem:[%s1190_s27 + $0xc0] sm:$0xff]  ;;  %v713_v42 = vld [vmem:[%s1190_s27 + $0x58] sm:$0xff]  ;;  %680 = vst.msk [vmem:[%s1190_s27 + $0x68] sm:$0xff] %vm223_vm0, %v647_v43 }
 0x109   : > { %840 = vst.msk [vmem:[%s1190_s27 + $0x50] sm:$0xff] %vm223_vm0, %v808_v40  ;;  %v824_v45 = vsel %vm760_vm4, %v728_v29, %v792_v38  ;;  %vm758_vm6 = vcmp.ge.f32.partialorder %v726_v41, 0.0  ;;  %v790_v47 = vmul.f32 0.2, %v726_v41  ;;  %v729_v48 = vld [vmem:[%s1190_s27 + $0xd8] sm:$0xff]  ;;  %vm745_vm7 = vcmp.ge.f32.partialorder %v713_v42, 0.0 }
 0x10a   : > { %v806_v46 = vsel %vm742_vm5, %v710_v30, %v774_v39  ;;  %856 = vst.msk [vmem:[%s1190_s27 + $0xd0] sm:$0xff] %vm223_vm0, %v824_v45  ;;  %v777_v49 = vmul.f32 0.2, %v713_v42  ;;  %vm761_vm8 = vcmp.ge.f32.partialorder %v729_v48, 0.0  ;;  %v793_v50 = vmul.f32 0.2, %v729_v48 }
 0x10b   : > { %838 = vst.msk [vmem:[%s1190_s27 + $0x40] sm:$0xff] %vm223_vm0, %v806_v46  ;;  %696 = vst.msk [vmem:[%s1190_s27 + $0xe8] sm:$0xff] %vm223_vm0, %v663_v44  ;;  %v822_v51 = vsel %vm758_vm6, %v726_v41, %v790_v47  ;;  %v711_v52 = vld [vmem:[%s1190_s27 + $0x48] sm:$0xff]  ;;  %v716_v54 = vld [vmem:[%s1190_s27 + $0x70] sm:$0xff] }
 0x10c   : > { %v727_v53 = vld [vmem:[%s1190_s27 + $0xc8] sm:$0xff]  ;;  %854 = vst.msk [vmem:[%s1190_s27 + $0xc0] sm:$0xff] %vm223_vm0, %v822_v51  ;;  %v809_v55 = vsel %vm745_vm7, %v713_v42, %v777_v49  ;;  %v825_v56 = vsel %vm761_vm8, %v729_v48, %v793_v50  ;;  %vm743_vm9 = vcmp.ge.f32.partialorder %v711_v52, 0.0  ;;  %v775_v57 = vmul.f32 0.2, %v711_v52  ;;  %v732_v58 = vld [vmem:[%s1190_s27 + $0xf0] sm:$0xff] }
 0x10d   : > { %v714_v59 = vld [vmem:[%s1190_s27 + $0x60] sm:$0xff]  ;;  %841 = vst.msk [vmem:[%s1190_s27 + $0x58] sm:$0xff] %vm223_vm0, %v809_v55  ;;  %857 = vst.msk [vmem:[%s1190_s27 + $0xd8] sm:$0xff] %vm223_vm0, %v825_v56  ;;  %vm759_vm10 = vcmp.ge.f32.partialorder %v727_v53, 0.0  ;;  %v791_v61 = vmul.f32 0.2, %v727_v53 }
 0x10e   : > { %v730_v60 = vld [vmem:[%s1190_s27 + $0xe0] sm:$0xff]  ;;  %vm748_vm11 = vcmp.ge.f32.partialorder %v716_v54, 0.0  ;;  %v780_v62 = vmul.f32 0.2, %v716_v54  ;;  %v807_v63 = vsel %vm743_vm9, %v711_v52, %v775_v57  ;;  %vm764_vm12 = vcmp.ge.f32.partialorder %v732_v58, 0.0  ;;  %v717_v1 = vld [vmem:[%s1190_s27 + $0x78] sm:$0xff] }
 0x10f   : > { %v796_v0 = vmul.f32 0.2, %v732_v58  ;;  %vm746_vm13 = vcmp.ge.f32.partialorder %v714_v59, 0.0  ;;  %v733_v2 = vld [vmem:[%s1190_s27 + $0xf8] sm:$0xff]  ;;  %839 = vst.msk [vmem:[%s1190_s27 + $0x48] sm:$0xff] %vm223_vm0, %v807_v63  ;;  %v823_v3 = vsel %vm759_vm10, %v727_v53, %v791_v61  ;;  %vm762_vm14 = vcmp.ge.f32.partialorder %v730_v60, 0.0 }
 0x110   : > { %v812_v4 = vsel %vm748_vm11, %v716_v54, %v780_v62  ;;  %v778_v5 = vmul.f32 0.2, %v714_v59  ;;  %855 = vst.msk [vmem:[%s1190_s27 + $0xc8] sm:$0xff] %vm223_vm0, %v823_v3  ;;  %v794_v7 = vmul.f32 0.2, %v730_v60  ;;  %vm749_vm15 = vcmp.ge.f32.partialorder %v717_v1, 0.0 }
 0x111   : > { %844 = vst.msk [vmem:[%s1190_s27 + $0x70] sm:$0xff] %vm223_vm0, %v812_v4  ;;  %v828_v6 = vsel %vm764_vm12, %v732_v58, %v796_v0  ;;  %v781_v8 = vmul.f32 0.2, %v717_v1  ;;  %vm765_vm1 = vcmp.ge.f32.partialorder %v733_v2, 0.0  ;;  %v797_v10 = vmul.f32 0.2, %v733_v2 }
 0x112   : > { %860 = vst.msk [vmem:[%s1190_s27 + $0xf0] sm:$0xff] %vm223_vm0, %v828_v6  ;;  %v810_v9 = vsel %vm746_vm13, %v714_v59, %v778_v5  ;;  %v715_v11 = vld [vmem:[%s1190_s27 + $0x68] sm:$0xff]  ;;  %v826_v13 = vsel %vm762_vm14, %v730_v60, %v794_v7 }
 0x113   : > { %v731_v12 = vld [vmem:[%s1190_s27 + $0xe8] sm:$0xff]  ;;  %842 = vst.msk [vmem:[%s1190_s27 + $0x60] sm:$0xff] %vm223_vm0, %v810_v9  ;;  %v813_v14 = vsel %vm749_vm15, %v717_v1, %v781_v8  ;;  %vm747_vm2 = vcmp.ge.f32.partialorder %v715_v11, 0.0  ;;  %v779_v15 = vmul.f32 0.2, %v715_v11  ;;  %858 = vst.msk [vmem:[%s1190_s27 + $0xe0] sm:$0xff] %vm223_vm0, %v826_v13  ;;  %v829_v16 = vsel %vm765_vm1, %v733_v2, %v797_v10 }
 0x114   : > { %845 = vst.msk [vmem:[%s1190_s27 + $0x78] sm:$0xff] %vm223_vm0, %v813_v14  ;;  %vm763_vm3 = vcmp.ge.f32.partialorder %v731_v12, 0.0  ;;  %v795_v17 = vmul.f32 0.2, %v731_v12  ;;  %861 = vst.msk [vmem:[%s1190_s27 + $0xf8] sm:$0xff] %vm223_vm0, %v829_v16 }
 0x115   : > { %v811_v18 = vsel %vm747_vm2, %v715_v11, %v779_v15 }
 0x116   : > { %843 = vst.msk [vmem:[%s1190_s27 + $0x68] sm:$0xff] %vm223_vm0, %v811_v18  ;;  %v827_v19 = vsel %vm763_vm3, %v731_v12, %v795_v17 }
 0x117   : > { %859 = vst.msk [vmem:[%s1190_s27 + $0xe8] sm:$0xff] %vm223_vm0, %v827_v19 }
 0x118 PF: > { %s12_s11 = sadd.s32 1, %s1137_s11   ;;  %s1500_s9 = smov %s1133_s10 }
 0x119   : > { %p9_p5 = scmp.ge.s32.totalorder %s12_s11, 4   ;;  %s1501_s10 = smov %s1503_s12 }
 0x11b   :  { %11 = sbr.rel (!%p9_p5) target bundleno = 2 (0x2), region = 69 }

</bundles_post_ra>
